<compile_context>
chip_gen: v7x
topology: tpu7x:2x2x1
jax: 0.10.0
libtpu: 0.0.40
codegen_flags: <defaults>
</compile_context>

<pallas_src>
import jax
import jax.numpy as jnp
from jax.experimental import pallas as pl
from jax.experimental.pallas import tpu as pltpu


def _round_down(x: int, m: int) -> int:
    return (x // m) * m


def _vmem_budget_bytes() -> int:
    """~75% of physical per-core VMEM; conservative 64 MiB (v7x) fallback."""
    try:
        phys = int(pltpu.get_tpu_info().vmem_capacity_bytes)
    except Exception:
        phys = 64 << 20
    return max(16 << 20, (phys * 3) // 4)


def token_embedding_kernel(x_ref, w_ref, b_ref, o_ref):
    # x_ref: (TM, c_in)   w_ref: (c_in, d_model)   b_ref: (1, d_model) f32
    # o_ref: (TM, d_model)
    c_in = x_ref.shape[1]
    if c_in <= 8:
        # Tiny-K path: one load of x and w, then unrolled VPU FMAs (filler
        # work under the DMA bottleneck; avoids per-k sub-lane VMEM reads).
        xv = x_ref[...].astype(jnp.float32)
        wv = w_ref[...].astype(jnp.float32)
        acc = jnp.broadcast_to(b_ref[...], o_ref.shape).astype(jnp.float32)
        for k in range(c_in):
            acc = acc + xv[:, k:k + 1] * wv[k:k + 1, :]
        o_ref[...] = acc.astype(o_ref.dtype)
    else:
        acc = jnp.dot(x_ref[...], w_ref[...], preferred_element_type=jnp.float32)
        o_ref[...] = (acc + b_ref[...]).astype(o_ref.dtype)


def token_embedding(x, weight, bias, *, tm_target: int = 2048):
    """x: (B, S, c_in); weight: (d_model, c_in) [PyTorch layout]; bias: (d_model,)."""
    B, S, c_in = x.shape
    d_model = weight.shape[0]
    M = B * S
    dsize = jnp.dtype(x.dtype).itemsize

    # One-off tiny transpose to (c_in, d_model); bias as (1, d_model) f32 row.
    w_t = weight.T
    b2d = bias.reshape(1, d_model).astype(jnp.float32)
    resident_bytes = (c_in * d_model * jnp.dtype(w_t.dtype).itemsize
                      + d_model * 4)

    # --- Row-tile (TM) selection --------------------------------------------
    if M <= 8:
        TM = M  # single full-extent block (block dim == full array dim)
    else:
        budget = _vmem_budget_bytes()
        stream_bytes_per_row = (c_in + d_model) * dsize
        # VMEM cap: double-buffered x/out tiles + resident weight/bias (2-deep
        # by default) + ~4 MiB margin for Mosaic internal scratch.
        avail = max(0, budget - 2 * resident_bytes - (4 << 20))
        max_tm_vmem = max(8, _round_down(avail // (2 * stream_bytes_per_row), 8))
        # Keep >= ~4 grid steps when M allows (pipelining + megacore split).
        max_tm_steps = max(8, _round_down(pl.cdiv(M, 4), 8))
        TM = max(8, min(_round_down(tm_target, 8), max_tm_vmem, max_tm_steps))

    grid = (pl.cdiv(M, TM),)  # ragged last block is masked by Pallas
    x2d = x.reshape(M, c_in)

    vmem_limit = int(min(
        _vmem_budget_bytes(),
        max(8 << 20,
            2 * TM * (c_in + d_model) * dsize   # double-buffered x + out tiles
            + 2 * resident_bytes                # resident weight/bias buffers
            + (4 << 20))))                      # Mosaic scratch margin

    cost = pl.CostEstimate(
        flops=2 * M * c_in * d_model,
        transcendentals=0,
        bytes_accessed=M * c_in * dsize + M * d_model * dsize + resident_bytes)

    out2d = pl.pallas_call(
        token_embedding_kernel,
        out_shape=jax.ShapeDtypeStruct((M, d_model), x.dtype),
        grid=grid,
        in_specs=[
            pl.BlockSpec((TM, c_in), lambda i: (i, 0)),       # streamed x rows
            # Resident weight / bias (constant index_map -> DMA'd once).
            # TODO(synk): pipeline_mode=pl.Buffered(1) would halve their VMEM
            # footprint; left at default buffering for lowering compatibility.
            pl.BlockSpec((c_in, d_model), lambda i: (0, 0)),
            pl.BlockSpec((1, d_model), lambda i: (0, 0)),
        ],
        out_specs=pl.BlockSpec((TM, d_model), lambda i: (i, 0)),
        compiler_params=pltpu.CompilerParams(
            dimension_semantics=("parallel",),
            vmem_limit_bytes=vmem_limit,
        ),
        cost_estimate=cost,
    )(x2d, w_t, b2d)

    return out2d.reshape(B, S, d_model)


if __name__ == "__main__":
    # Small shapes consistent with the module: (batch, seq, c_in) -> (batch, seq, d_model)
    B, S, c_in, d_model = 2, 8, 4, 32

    key = jax.random.PRNGKey(0)
    kx, kw, kb = jax.random.split(key, 3)

    # PyTorch-style Linear init: U(-1/sqrt(c_in), 1/sqrt(c_in))
    bound = 1.0 / (c_in ** 0.5)
    weight = jax.random.uniform(kw, (d_model, c_in), jnp.float32, -bound, bound)
    bias = jax.random.uniform(kb, (d_model,), jnp.float32, -bound, bound)
    x = jax.random.normal(kx, (B, S, c_in), jnp.float32)

    out = jax.block_until_ready(token_embedding(x, weight, bias))

    # Reference: same math as torch.nn.Linear forward.
    ref = x @ weight.T + bias
    assert out.shape == (B, S, d_model)
    assert jnp.allclose(out, ref, atol=1e-5, rtol=1e-5)

    print("KERNEL_OK")
</pallas_src>

<mosaic_0001>
module attributes {stable_mosaic.version = 11 : i64} {
  func.func @token_embedding_kernel(%arg0: i32, %arg1: memref<8x4xf32, #tpu.memory_space<vmem>>, %arg2: memref<4x32xf32, #tpu.memory_space<vmem>>, %arg3: memref<1x32xf32, #tpu.memory_space<vmem>>, %arg4: memref<8x32xf32, #tpu.memory_space<vmem>>) attributes {dimension_semantics = [#tpu.dimension_semantics<parallel>], iteration_bounds = array<i64: 2>, scalar_prefetch = 0 : i64, scratch_operands = 0 : i64, tpu.core_type = #tpu.core_type<tc>, window_params = [{transform_indices = @transform_0, window_bounds = array<i64: 8, 4>}, {pipeline_mode = #tpu.pipeline_mode<synchronous>, transform_indices = @transform_1, window_bounds = array<i64: 4, 32>}, {pipeline_mode = #tpu.pipeline_mode<synchronous>, transform_indices = @transform_2, window_bounds = array<i64: 1, 32>}, {transform_indices = @transform_3, window_bounds = array<i64: 8, 32>}]} {
    %c0 = arith.constant 0 : index
    %c0_0 = arith.constant 0 : index
    %0 = vector.load %arg1[%c0, %c0_0] : memref<8x4xf32, #tpu.memory_space<vmem>>, vector<8x4xf32>
    %c0_1 = arith.constant 0 : index
    %c0_2 = arith.constant 0 : index
    %1 = vector.load %arg2[%c0_1, %c0_2] : memref<4x32xf32, #tpu.memory_space<vmem>>, vector<4x32xf32>
    %c0_3 = arith.constant 0 : index
    %c0_4 = arith.constant 0 : index
    %2 = vector.load %arg3[%c0_3, %c0_4] : memref<1x32xf32, #tpu.memory_space<vmem>>, vector<1x32xf32>
    %3 = vector.shape_cast %2 : vector<1x32xf32> to vector<1x32xf32>
    %4 = vector.broadcast %3 : vector<1x32xf32> to vector<8x32xf32>
    %5 = vector.extract_strided_slice %0 {offsets = [0, 0], sizes = [8, 1], strides = [1, 1]} : vector<8x4xf32> to vector<8x1xf32>
    %6 = vector.extract_strided_slice %1 {offsets = [0, 0], sizes = [1, 32], strides = [1, 1]} : vector<4x32xf32> to vector<1x32xf32>
    %7 = vector.broadcast %5 : vector<8x1xf32> to vector<8x32xf32>
    %8 = vector.broadcast %6 : vector<1x32xf32> to vector<8x32xf32>
    %9 = arith.mulf %7, %8 : vector<8x32xf32>
    %10 = arith.addf %4, %9 : vector<8x32xf32>
    %11 = vector.extract_strided_slice %0 {offsets = [0, 1], sizes = [8, 1], strides = [1, 1]} : vector<8x4xf32> to vector<8x1xf32>
    %12 = vector.extract_strided_slice %1 {offsets = [1, 0], sizes = [1, 32], strides = [1, 1]} : vector<4x32xf32> to vector<1x32xf32>
    %13 = vector.broadcast %11 : vector<8x1xf32> to vector<8x32xf32>
    %14 = vector.broadcast %12 : vector<1x32xf32> to vector<8x32xf32>
    %15 = arith.mulf %13, %14 : vector<8x32xf32>
    %16 = arith.addf %10, %15 : vector<8x32xf32>
    %17 = vector.extract_strided_slice %0 {offsets = [0, 2], sizes = [8, 1], strides = [1, 1]} : vector<8x4xf32> to vector<8x1xf32>
    %18 = vector.extract_strided_slice %1 {offsets = [2, 0], sizes = [1, 32], strides = [1, 1]} : vector<4x32xf32> to vector<1x32xf32>
    %19 = vector.broadcast %17 : vector<8x1xf32> to vector<8x32xf32>
    %20 = vector.broadcast %18 : vector<1x32xf32> to vector<8x32xf32>
    %21 = arith.mulf %19, %20 : vector<8x32xf32>
    %22 = arith.addf %16, %21 : vector<8x32xf32>
    %23 = vector.extract_strided_slice %0 {offsets = [0, 3], sizes = [8, 1], strides = [1, 1]} : vector<8x4xf32> to vector<8x1xf32>
    %24 = vector.extract_strided_slice %1 {offsets = [3, 0], sizes = [1, 32], strides = [1, 1]} : vector<4x32xf32> to vector<1x32xf32>
    %25 = vector.broadcast %23 : vector<8x1xf32> to vector<8x32xf32>
    %26 = vector.broadcast %24 : vector<1x32xf32> to vector<8x32xf32>
    %27 = arith.mulf %25, %26 : vector<8x32xf32>
    %28 = arith.addf %22, %27 : vector<8x32xf32>
    %c0_5 = arith.constant 0 : index
    %c0_6 = arith.constant 0 : index
    %29 = vector.load %arg4[%c0_5, %c0_6] : memref<8x32xf32, #tpu.memory_space<vmem>>, vector<8x32xf32>
    tpu.vector_store %arg4[%c0_5, %c0_6], %28 {strides = array<i32>} : memref<8x32xf32, #tpu.memory_space<vmem>>, vector<8x32xf32>,
    return
  }
  func.func @transform_0(%arg0: i32) -> (i32, i32) {
    %c0_i32 = arith.constant 0 : i32
    %c0_i32_0 = arith.constant 0 : i32
    return %arg0, %c0_i32 : i32, i32
  }
  func.func @transform_1(%arg0: i32) -> (i32, i32) {
    %c0_i32 = arith.constant 0 : i32
    %c0_i32_0 = arith.constant 0 : i32
    %c0_i32_1 = arith.constant 0 : i32
    return %c0_i32, %c0_i32_0 : i32, i32
  }
  func.func @transform_2(%arg0: i32) -> (i32, i32) {
    %c0_i32 = arith.constant 0 : i32
    %c0_i32_0 = arith.constant 0 : i32
    %c0_i32_1 = arith.constant 0 : i32
    return %c0_i32, %c0_i32_0 : i32, i32
  }
  func.func @transform_3(%arg0: i32) -> (i32, i32) {
    %c0_i32 = arith.constant 0 : i32
    %c0_i32_0 = arith.constant 0 : i32
    return %arg0, %c0_i32 : i32, i32
  }
}

</mosaic_0001>

<bundles_post_ra>
// kernel: tpu_custom_call.1
= control target key start
LH: loop header
LB: loop body
LE: loop exit
PB: predicated region body
PF: predicated region fallthrough
CT: control target
= control target key end

     0   :  { %8 = vsyncpa [#allocation3], 0  ;;  %s545_s0 = inlined_call_operand.vmem [shape: f32[16,4], index: 0, kind: input, shape index: {}]   ;;  %s546_s1 = inlined_call_operand.vmem [shape: f32[4,32], index: 1, kind: input, shape index: {}]   ;;  %s547_s2 = inlined_call_operand.vmem [shape: f32[1,32], index: 2, kind: input, shape index: {}]   ;;  %s548_s3 = inlined_call_operand.hbm [shape: f32[16,32], index: 3, kind: output, shape index: {}]  }
   0x1   :  { %10 = vsyncpa [#allocation3 + $0x1], 0  ;;  %s439_s12 = smov 0   ;;  %s441_s13 = smov 0  }
   0x2   :  { %s443_s14 = smov 0   ;;  %s445_s15 = smov 0  }
   0x3 LB: > { %s460_s16 = sadd.s32 4294967295, %s412_s15   ;;  %s291_s17 = sadd.s32 4294967294, %s412_s15   ;;  %s412_s15 = sphi %s445_s15, %s554_s15   ;;  %s408_s14 = sphi %s443_s14, %s553_s14   ;;  %s404_s13 = sphi %s441_s13, %s552_s13   ;;  %s400_s12 = sphi %s439_s12, %s551_s12  }
   0x4   : > { %s464_s18 = sadd.s32 1, %s412_s15   ;;  %s91_s19 = sadd.s32 1, %s408_s14 }
   0x5   : > { %s88_s20 = ssub.s32 %s412_s15, %s464_s18  ;;  %p101_p0 = scmp.ne.s32.totalorder %s408_s14, %s404_s13 }
   0x6   : > { %p89_p1 = scmp.eq.s32.totalorder %s88_s20, 0  ;;  %p102_p2 = scmp.eq.s32.totalorder %s460_s16, 1 }
   0x7   : > { %p107_p3 = scmp.ne.s32.totalorder %s404_s13, %s400_s12  ;;  %p108_p4 = scmp.eq.s32.totalorder %s291_s17, 1 }
   0x8   : > { %s475_s21 = scalar_select %p89_p1, %s408_s14, %s91_s19  }
   0x9   : > { %p477_p5 = por %p102_p2, %p101_p0  ;;  %p481_p6 = por %p108_p4, %p107_p3 }
   0xa   : > { %p294_p7 = scmp.ge.s32.totalorder %s412_s15, 1  ;;  %p139_p8 = scmp.lt.s32.totalorder %s412_s15, 3 }
   0xc   : > { %p140_p9 = pnand %p294_p7, %p139_p8 }
   0xd   : > { %p162_p10 = scmp.lt.s32.totalorder (!%p140_p9), %s460_s16, 1  ;;  %v414_v0 = vmov (!%p140_p9), 0   ;;  %v415_v1 = vmov (!%p140_p9), 2   ;;  %v416_v3 = vmov (!%p140_p9), 1   ;;  %v417_v4 = vmov (!%p140_p9), 3   ;;  %s159_s4 = sand.u32 (!%p140_p9), 1, %s404_s13  }
   0xe   : > { %143 = sbr.rel (%p140_p9) target bundleno = 181 (0xb5), region = 32  ;;  %345 = vset.pattern.permute.xlu0 (!%p140_p9), %v414_v0  ;;  %347 = vset.pattern.permute.xlu1 (!%p140_p9), %v415_v1  ;;  %v180_v5 = vlaneseq (!%p140_p9)  ;;  %v167_v8 = vld [vmem:[%s546_s1] sm:$0xf] (!%p140_p9)  ;;  %s295_s7 = sshll.u32 (!%p140_p9), %s159_s4, 3  ;;  %vm216_vm0 = vcmask (!%p140_p9), 261120  }
   0xf   : > { %v297_v17 = vld [vmem:[%s547_s2] ss:$0 sm:$0xff] (!%p140_p9)  ;;  %s299_s8 = sshll.u32 (!%p140_p9), %s460_s16, 7  ;;  %s161_s9 = scalar_lea.vmem (!%p140_p9), [#allocation2], %s295_s7 }
  0x10   : > { %v181_v6 = vshrl.u32 (!%p140_p9), %v180_v5, 7  ;;  %s232_s10 = sshll.u32 (!%p140_p9), %s161_s9, 4  ;;  %s503_s19 = scalar_lea.hbm (!%p140_p9), %s548_s3, %s299_s8  ;;  %s505_s10 = int_to_ptr.vmem [resolvable:$true] %s232_s10 }
  0x11   : > { %s219_s20 = scalar_lea.sflag (!%p140_p9), [#allocation3], %s159_s4 }
  0x12   : > { %v182_v7 = vsub.s32 (!%p140_p9), 0, %v181_v6  ;;  %v192_v10 = vsub.s32 (!%p140_p9), 1, %v181_v6  ;;  %v202_v12 = vsub.s32 (!%p140_p9), 2, %v181_v6  ;;  %v212_v14 = vsub.s32 (!%p140_p9), 3, %v181_v6 }
  0x14   : > { %v183_v9 = vrot.slane (!%p140_p9), %v167_v8, %v182_v7  ;;  %v193_v16 = vrot.slane (!%p140_p9), %v167_v8, %v192_v10  ;;  %v203_v18 = vrot.slane (!%p140_p9), %v167_v8, %v202_v12  ;;  %v213_v19 = vrot.slane (!%p140_p9), %v167_v8, %v212_v14 }
  0x15   : > { %s163_s24 = scalar_select %p162_p10, %s460_s16, 1 }
  0x16   : > { %s418_s16 = smov [#allocation2]  }
  0x17   : > { %s296_s25 = sshll.u32 %s163_s24, 3  ;;  %s350_s24 = scalar_lea.vmem %s505_s10, 128 }
  0x18   : > { %s165_s28 = scalar_lea.vmem %s545_s0, %s296_s25  ;;  %p351_p11 = scmp.ne.s32.totalorder %s505_s10, %s350_s24 }
  0x19   : > { %v166_v2 = vld [vmem:[%s165_s28] sm:$0xff]  ;;  %s354_s25 = sshll.u32 %s418_s16, 4  ;;  %s355_s25 = int_to_ptr.vmem [resolvable:$false] %s354_s25 }
  0x1a   : > { %177 = vperm.xlu0 %345, %v166_v2   ;;  %197 = vperm.xlu1 %347, %v166_v2   ;;  %p352_p12 = pnand %p351_p11, %p477_p5  ;;  %s356_s26 = scalar_lea.vmem %s355_s25, 256 }
  0x1b   : > { %p357_p0 = scmp.lt.s32.totalorder %s505_s10, %s355_s25  ;;  %p358_p1 = scmp.lt.s32.totalorder %s356_s26, %s350_s24 }
  0x1c   : > { %p353_p13 = pneg %p352_p12 }
  0x1d   : > { %p359_p2 = por %p358_p1, %p357_p0 }
  0x1e   : > { %346 = vset.pattern.permute.xlu0 %v416_v3  ;;  %348 = vset.pattern.permute.xlu1 %v417_v4 }
  0x1f   : > { %187 = vperm.xlu0 %346, %v166_v2   ;;  %207 = vperm.xlu1 %348, %v166_v2   ;;  %p360_p3 = pnand %p359_p2, %p353_p13 }
  0x23   : > { %349 = vset.pattern.permute.xlu0 %v417_v4 }
  0x99   : > { %v178_v11 = vpop.permute.xlu0 %177  ;;  %v198_v13 = vpop.permute.xlu1 %197 }
  0x9a   : > { %v184_v15 = vmul.f32 %v183_v9, %v178_v11  ;;  %v204_v24 = vmul.f32 %v203_v18, %v198_v13 }
  0x9c   : > { %v185_v22 = vadd.f32 %v297_v17, %v184_v15 }
  0x9e   : > { %v188_v20 = vpop.permute.xlu0 %187  ;;  %v208_v21 = vpop.permute.xlu1 %207 }
  0x9f   : > { %v194_v23 = vmul.f32 %v193_v16, %v188_v20  ;;  %v214_v26 = vmul.f32 %v213_v19, %v208_v21 }
  0xa1   : > { %v195_v25 = vadd.f32 %v194_v23, %v185_v22 }
  0xa3   : > { %v205_v27 = vadd.f32 %v204_v24, %v195_v25 }
  0xa5   : > { %v215_v28 = vadd.f32 %v214_v26, %v205_v27 }
  0xa7   : > { %217 = vst.msk [vmem:[%s161_s9] sm:$0xff] %vm216_vm0, %v215_v28 }
  0xa8   : > { %363 = shalt.err (!%p360_p3)
}
  0xa9   : > { %s364_s27 = scalar_lea.hbm %s503_s19, 128  ;;  %s368_s30 = scalar_lea.hbm %s548_s3, 256 }
  0xaa   : > { %p365_p4 = scmp.ne.s32.totalorder %s503_s19, %s364_s27  ;;  %p369_p9 = scmp.lt.u32.totalorder %s503_s19, %s548_s3 }
  0xab   : > { %p370_p10 = scmp.lt.u32.totalorder %s368_s30, %s364_s27  ;;  %p372_p12 = scmp.lt.u32.totalorder %s364_s27, %s503_s19 }
  0xac   : > { %p366_p7 = pnand %p365_p4, %p477_p5 }
  0xad   : > { %p371_p11 = por %p370_p10, %p369_p9 }
  0xae   : > { %p367_p8 = pneg %p366_p7 }
  0xaf   : > { %p373_p13 = por %p372_p12, %p371_p11 }
  0xb1   : > { %p374_p0 = pnand %p373_p13, %p367_p8 }
  0xb3   : > { %377 = shalt.err (!%p374_p0)
}
  0xb4   : > { %302 = dma.vmem_to_hbm [thread:$0]  (%p477_p5), %s505_s10, 128, %s503_s19, %s219_s20  }
  0xb5 PF: > { %p308_p1 = scmp.ge.s32.totalorder %s412_s15, 2  ;;  %s244_s6 = sand.u32 1, %s400_s12  }
  0xb6   : > { %s245_s7 = scalar_lea.sflag [#allocation3], %s244_s6 }
  0xb7   : > { %p305_p2 = pnand %p308_p1, %p481_p6 }
  0xb9   : > { %395 = dma.done.wait (!%p305_p2), %s245_s7, 128  }
  0xba   : > { %397 = vsyncadd (!%p305_p2), %s245_s7, 4294967168  ;;  %p13_p3 = scmp.ge.s32.totalorder %s464_s18, 4   ;;  %s551_s12 = smov %s404_s13 }
  0xbb   : > { %s552_s13 = smov %s408_s14  ;;  %s553_s14 = smov %s475_s21 }
  0xbc   : > { %s554_s15 = smov %s464_s18  ;;  %15 = sbr.rel (!%p13_p3) target bundleno = 3 (0x3), region = 67 }
  0xc3   :  { %250 = vsyncpa [#allocation3], 1 }
  0xc4   :  { %252 = vsyncpa [#allocation3 + $0x1], 1 }

</bundles_post_ra>
